<compile_context>
chip_gen: v7x
topology: tpu7x:2x2x1
jax: 0.10.0
libtpu: 0.0.40
codegen_flags: <defaults>
</compile_context>

<pallas_src>
import jax
import jax.numpy as jnp
from jax.experimental import pallas as pl
from jax.experimental.pallas import tpu as pltpu


def _normalize_kernel(x_ref, mean_ref, inv_std_ref, o_ref):
    # x_ref / o_ref: (rt, ct) tile.  mean_ref / inv_std_ref: (rt, 1) per-row
    # values broadcast across the lane axis.
    x = x_ref[...].astype(jnp.float32)
    o_ref[...] = ((x - mean_ref[...]) * inv_std_ref[...]).astype(o_ref.dtype)


def _pick_tiles(R, L, itemsize):
    """Choose (row_tile, lane_tile) satisfying the (8, 128) block constraint,
    targeting ~2 MiB blocks and preferring lane tiles that divide L."""
    MAX_CT = 2048  # lanes per block (f32: 8 KiB/row-group, ~2 MiB with rt rows)

    # ---- lane (minor) tile ----
    if L <= MAX_CT:
        ct = L                                  # full extent -> always legal
    else:
        ct = 0
        # Prefer the largest 128-multiple <= MAX_CT that divides L (no ragged
        # tail -> unmasked stores on every block).
        for cand in range(MAX_CT, 127, -128):
            if L % cand == 0:
                ct = cand
                break
        if ct == 0:
            ct = MAX_CT                         # ragged last block is masked

    # ---- sublane (second-minor) tile ----
    # Align to the dtype-native packed sublane count: 8 (f32), 16 (bf16),
    # 32 (int8 / fp8).
    pack = max(1, 4 // max(1, itemsize))
    sub = 8 * pack
    target_bytes = 2 * 1024 * 1024              # ~2 MiB per block
    rt_want = max(1, target_bytes // max(1, ct * itemsize))
    if rt_want >= R or R <= sub:
        rt = R                                  # full extent -> always legal
    else:
        rt = max(sub, (rt_want // sub) * sub)
    return rt, ct


def normalize(x, mean, std):
    """x: (N, C, H, W); mean/std: length-C. Returns (x - mean[c]) / std[c]."""
    N, C, H, W = x.shape
    mean = jnp.asarray(mean, dtype=jnp.float32).reshape(C)
    std = jnp.asarray(std, dtype=jnp.float32).reshape(C)
    inv_std = 1.0 / std                         # exact f32 divide, once

    R = N * C                                   # one row per (batch, channel)
    L = H * W                                   # lane-dense flattened spatial
    itemsize = jnp.dtype(x.dtype).itemsize

    x2 = x.reshape(R, L)                        # free reshape (contiguous NCHW)
    mean_rows = jnp.tile(mean, N).reshape(R, 1)       # row r -> channel r % C
    inv_std_rows = jnp.tile(inv_std, N).reshape(R, 1)

    rt, ct = _pick_tiles(R, L, itemsize)
    grid_r = pl.cdiv(R, rt)
    grid_c = pl.cdiv(L, ct)

    x_spec_shape = (rt, ct)
    s_spec_shape = (rt, 1)
    # Lead with the axis that has more blocks so the v7x megacore split
    # (leading "parallel" axis) stays balanced. No-op on single-TC chips.
    if grid_c >= grid_r:
        grid = (grid_c, grid_r)
        x_map = lambda j, i: (i, j)
        s_map = lambda j, i: (i, 0)
    else:
        grid = (grid_r, grid_c)
        x_map = lambda i, j: (i, j)
        s_map = lambda i, j: (i, 0)

    block_bytes = rt * ct * itemsize
    # Explicit VMEM budget: ~2 buffers x (in tile + out tile) + scale/bias +
    # compiler scratch, with generous headroom.  Safe on v5e/v6e (128 MiB
    # physical) and within v7x's 32 MiB scoped default / 64 MiB physical.
    vmem_limit = min(max(6 * block_bytes + (4 << 20), 16 << 20), 32 << 20)

    cost = pl.CostEstimate(
        flops=2 * R * L,
        transcendentals=0,
        bytes_accessed=2 * R * L * itemsize + 2 * R * 4,
    )

    out2 = pl.pallas_call(
        _normalize_kernel,
        out_shape=jax.ShapeDtypeStruct((R, L), x.dtype),
        grid=grid,
        in_specs=[
            pl.BlockSpec(x_spec_shape, x_map),
            pl.BlockSpec(s_spec_shape, s_map),
            pl.BlockSpec(s_spec_shape, s_map),
        ],
        out_specs=pl.BlockSpec(x_spec_shape, x_map),
        compiler_params=pltpu.CompilerParams(
            dimension_semantics=("parallel", "parallel"),
            vmem_limit_bytes=vmem_limit,
        ),
        cost_estimate=cost,
    )(x2, mean_rows, inv_std_rows)
    return out2.reshape(N, C, H, W)


class Normalize:
    """JAX/Pallas equivalent of the PyTorch Normalize module."""

    def __init__(self, ms=None):
        if ms is None:
            self.ms = [(0.485, 0.456, 0.406), (0.229, 0.224, 0.225)]
        else:
            self.ms = ms

    def __call__(self, x):
        mean = jnp.array(self.ms[0], dtype=jnp.float32)
        std = jnp.array(self.ms[1], dtype=jnp.float32)
        return normalize(x, mean, std)


if __name__ == "__main__":
    key = jax.random.PRNGKey(0)
    # Default ms has 3 channels -> C must be 3.
    N, C, H, W = 2, 3, 16, 16
    x = jax.random.uniform(key, (N, C, H, W), dtype=jnp.float32)

    mod = Normalize()
    out = jax.block_until_ready(mod(x))

    # Reference check in plain JAX.
    mean = jnp.array(mod.ms[0], dtype=jnp.float32).reshape(1, C, 1, 1)
    std = jnp.array(mod.ms[1], dtype=jnp.float32).reshape(1, C, 1, 1)
    ref = (x - mean) / std
    assert out.shape == x.shape and out.dtype == x.dtype
    assert jnp.allclose(out, ref, atol=1e-5, rtol=1e-5)

    print("KERNEL_OK")
</pallas_src>

<mosaic_0001>
module attributes {stable_mosaic.version = 11 : i64} {
  func.func @_normalize_kernel(%arg0: i32, %arg1: i32, %arg2: memref<6x256xf32, #tpu.memory_space<vmem>>, %arg3: memref<6x1xf32, #tpu.memory_space<vmem>>, %arg4: memref<6x1xf32, #tpu.memory_space<vmem>>, %arg5: memref<6x256xf32, #tpu.memory_space<vmem>>) attributes {dimension_semantics = [#tpu.dimension_semantics<parallel>, #tpu.dimension_semantics<parallel>], iteration_bounds = array<i64: 1, 1>, scalar_prefetch = 0 : i64, scratch_operands = 0 : i64, tpu.core_type = #tpu.core_type<tc>, window_params = [{transform_indices = @transform_0, window_bounds = array<i64: 6, 256>}, {transform_indices = @transform_1, window_bounds = array<i64: 6, 1>}, {transform_indices = @transform_2, window_bounds = array<i64: 6, 1>}, {transform_indices = @transform_3, window_bounds = array<i64: 6, 256>}]} {
    %c0 = arith.constant 0 : index
    %c0_0 = arith.constant 0 : index
    %0 = vector.load %arg2[%c0, %c0_0] : memref<6x256xf32, #tpu.memory_space<vmem>>, vector<6x256xf32>
    %c0_1 = arith.constant 0 : index
    %c0_2 = arith.constant 0 : index
    %1 = vector.load %arg3[%c0_1, %c0_2] : memref<6x1xf32, #tpu.memory_space<vmem>>, vector<6x1xf32>
    %2 = vector.broadcast %1 : vector<6x1xf32> to vector<6x256xf32>
    %3 = arith.subf %0, %2 : vector<6x256xf32>
    %c0_3 = arith.constant 0 : index
    %c0_4 = arith.constant 0 : index
    %4 = vector.load %arg4[%c0_3, %c0_4] : memref<6x1xf32, #tpu.memory_space<vmem>>, vector<6x1xf32>
    %5 = vector.broadcast %4 : vector<6x1xf32> to vector<6x256xf32>
    %6 = arith.mulf %3, %5 : vector<6x256xf32>
    %c0_5 = arith.constant 0 : index
    %c0_6 = arith.constant 0 : index
    %7 = vector.load %arg5[%c0_5, %c0_6] : memref<6x256xf32, #tpu.memory_space<vmem>>, vector<6x256xf32>
    tpu.vector_store %arg5[%c0_5, %c0_6], %6 {strides = array<i32>} : memref<6x256xf32, #tpu.memory_space<vmem>>, vector<6x256xf32>,
    return
  }
  func.func @transform_0(%arg0: i32, %arg1: i32) -> (i32, i32) {
    %c0_i32 = arith.constant 0 : i32
    return %arg1, %arg0 : i32, i32
  }
  func.func @transform_1(%arg0: i32, %arg1: i32) -> (i32, i32) {
    %c0_i32 = arith.constant 0 : i32
    %c0_i32_0 = arith.constant 0 : i32
    return %arg1, %c0_i32 : i32, i32
  }
  func.func @transform_2(%arg0: i32, %arg1: i32) -> (i32, i32) {
    %c0_i32 = arith.constant 0 : i32
    %c0_i32_0 = arith.constant 0 : i32
    return %arg1, %c0_i32 : i32, i32
  }
  func.func @transform_3(%arg0: i32, %arg1: i32) -> (i32, i32) {
    %c0_i32 = arith.constant 0 : i32
    return %arg1, %arg0 : i32, i32
  }
}

</mosaic_0001>

<bundles_post_ra>
// kernel: tpu_custom_call.1
= control target key start
LH: loop header
LB: loop body
LE: loop exit
PB: predicated region body
PF: predicated region fallthrough
CT: control target
= control target key end

     0   :  { %v76_v1 = vmov 0   ;;  %s122_s0 = inlined_call_operand.vmem [shape: f32[6,256], index: 0, kind: input, shape index: {}]   ;;  %s123_s1 = inlined_call_operand.vmem [shape: f32[6,1], index: 1, kind: input, shape index: {}]   ;;  %s124_s2 = inlined_call_operand.vmem [shape: f32[6,1], index: 2, kind: input, shape index: {}]   ;;  %s125_s3 = inlined_call_operand.hbm [shape: f32[6,256], index: 3, kind: output, shape index: {}]  }
   0x1   :  { %v17_v0 = vld [vmem:[%s123_s1] sm:$0x3f]  ;;  %51 = vset.pattern.permute.xlu0 %v76_v1 }
   0x2   :  { %8 = vsyncpa [#allocation3], 0  ;;  %20 = vperm.xlu0 %51, %v17_v0   ;;  %v25_v2 = vld [vmem:[%s124_s2] sm:$0x3f]  ;;  %v16_v5 = vld [vmem:[%s122_s0 + $0x8] sm:$0x3f] }
   0x3   :  { %v15_v4 = vld [vmem:[%s122_s0] sm:$0x3f]  ;;  %s77_s20 = smov [#allocation2]  }
   0x4   :  { %s41_s1 = sshll.u32 %s77_s20, 4  ;;  %s42_s1 = int_to_ptr.vmem [resolvable:$true] %s41_s1 }
   0x5   :  { %s52_s2 = scalar_lea.vmem %s42_s1, 256  ;;  %p57_p1 = scmp.lt.s32.totalorder %s42_s1, %s42_s1 }
   0x6   :  { %28 = vperm.xlu0 %51, %v25_v2   ;;  %p53_p0 = scmp.ne.s32.totalorder %s42_s1, %s52_s2  ;;  %p58_p2 = scmp.lt.s32.totalorder %s52_s2, %s52_s2 }
   0x8   :  { %p59_p3 = por %p58_p2, %p57_p1 }
   0xa   :  { %p60_p4 = pnand %p59_p3, %p53_p0 }
  0x81   :  { %v21_v3 = vpop.permute.xlu0 %20 }
  0x82   :  { %v23_v6 = vsub.f32 %v15_v4, %v21_v3  ;;  %v24_v7 = vsub.f32 %v16_v5, %v21_v3 }
  0x85   :  { %v29_v8 = vpop.permute.xlu0 %28 }
  0x86   :  { %v31_v9 = vmul.f32 %v29_v8, %v23_v6  ;;  %v32_v10 = vmul.f32 %v29_v8, %v24_v7 }
  0x88   :  { %33 = vst [vmem:[#allocation2] sm:$0x3f] %v31_v9  ;;  %34 = vst [vmem:[#allocation2 + $0x8] sm:$0x3f] %v32_v10 }
  0x89   :  { %63 = shalt.err (!%p60_p4)
}
  0x8a   :  { %s64_s0 = scalar_lea.hbm %s125_s3, 256 }
  0x8b   :  { %p65_p5 = scmp.ne.s32.totalorder %s125_s3, %s64_s0  ;;  %p68_p6 = scmp.lt.u32.totalorder %s64_s0, %s125_s3 }
  0x8d   :  { %p70_p7 = pnand %p68_p6, %p65_p5 }
  0x8f   :  { %73 = shalt.err (!%p70_p7)
}
  0x90   :  { %44 = dma.vmem_to_hbm [thread:$0]  %s42_s1, 256, %s125_s3, [#allocation3]  }
  0x91   :  { %74 = dma.done.wait [#allocation3], 256  }
  0x92   :  { %75 = vsyncadd [#allocation3], 4294967040 }
  0x93   :  { %48 = vsyncpa [#allocation3], 1 }

</bundles_post_ra>
